<compile_context>
chip_gen: v7x
topology: tpu7x:2x2x1
jax: 0.10.0
libtpu: 0.0.40
codegen_flags: <defaults>
</compile_context>

<pallas_src>
import functools

import jax
import jax.numpy as jnp
from jax.experimental import pallas as pl
from jax.experimental.pallas import tpu as pltpu

_LANES = 128
_SUBLANES = 8


def _round_up(x, m):
    return ((x + m - 1) // m) * m


def _device_max_block_rows():
    """Per-generation max block rows (f32 (rows,128) block = rows/256 KiB)."""
    try:
        kind = jax.devices()[0].device_kind.lower()
    except Exception:  # pragma: no cover - defensive
        return 2048
    if "v5 lite" in kind or "v5e" in kind or "v5lite" in kind:
        return 1024   # stay well inside v5e's 16 MiB default scoped VMEM
    if "v7" in kind:
        return 4096   # amortize per-step overhead against 3.2 TB/s HBM
    return 2048       # v6e / default


def _mse_mask_kernel(o_ref, t_ref, om_ref, tm_ref, partial_ref, *,
                     block_rows, valid_rows_last, needs_mask):
    # Cast-in-VMEM: data/masks arrive in their native (possibly narrow) dtypes.
    o = o_ref[...].astype(jnp.float32) * om_ref[...].astype(jnp.float32)
    t = t_ref[...].astype(jnp.float32) * tm_ref[...].astype(jnp.float32)
    d = o - t
    sq = d * d

    def _partial_sum(x):
        # Pure-VPU partial reduce: collapse sublane groups of 8 into a
        # lane-dense (8, 128) partial; no scalar/XLU reduce, no SMEM acc.
        return jnp.sum(
            x.reshape(block_rows // _SUBLANES, _SUBLANES, _LANES), axis=0)

    if needs_mask:
        i = pl.program_id(0)
        last = pl.num_programs(0) - 1

        @pl.when(i != last)
        def _():
            # Hot path: full blocks pay no iota / compare / select.
            partial_ref[0] = _partial_sum(sq)

        @pl.when(i == last)
        def _():
            # Only the last block masks its overhang rows; grid-invariant
            # local iota vs. a static threshold.
            local_row = jax.lax.broadcasted_iota(
                jnp.int32, (block_rows, _LANES), 0)
            partial_ref[0] = _partial_sum(
                jnp.where(local_row < valid_rows_last, sq, 0.0))
    else:
        partial_ref[0] = _partial_sum(sq)


def _as_rows(x):
    """View x as a (rows, 128) slab in its native dtype.

    Reshape only (free for contiguous arrays).  Only when the element count is
    not a multiple of 128 is the ragged tail zero-padded (zeros contribute
    nothing to the sum of squares)."""
    flat = x.reshape(-1)
    rem = flat.size % _LANES
    if rem:
        # TODO(synk): a fully pad-free ragged-tail path would need a manual
        # DMA kernel; this pad copy only triggers when n_elems % 128 != 0.
        flat = jnp.pad(flat, (0, _LANES - rem))
    return flat.reshape(-1, _LANES)


def mse_mask(output, target, output_mask, target_mask, mask_flag=True):
    """Pallas implementation of MSEMask.forward (mask_flag=True path)."""
    if not mask_flag:
        # TODO(synk): the PyTorch else-branch `nn.MSELoss(output, target)` is a
        # bug (constructs a module, not a loss value); only mask_flag=True is
        # a meaningful forward pass.
        raise NotImplementedError(
            "mask_flag=False path is ill-defined in the reference")

    n_elems = int(output.size)

    o2 = _as_rows(output)
    t2 = _as_rows(target)
    om2 = _as_rows(output_mask)
    tm2 = _as_rows(target_mask)

    rows = o2.shape[0]

    # --- block-size selection -------------------------------------------
    max_rows = _device_max_block_rows()
    # Guarantee >= 2 grid steps for large-enough inputs so v7x megacore can
    # shard them across both TensorCores (costs one ~0.35us step elsewhere).
    if rows > 512:
        max_rows = min(max_rows, _round_up(pl.cdiv(rows, 2), 32))

    if rows <= max_rows:
        # Single block. Prefer the exact (full-extent) row count when it is a
        # sublane multiple; otherwise round up to the int8 packed tile (32).
        block_rows = rows if rows % _SUBLANES == 0 else _round_up(rows, 32)
    else:
        block_rows = max_rows  # multiple of 32 by construction

    nblocks = pl.cdiv(rows, block_rows)
    valid_rows_last = rows - (nblocks - 1) * block_rows
    needs_mask = valid_rows_last < block_rows

    tile_spec = pl.BlockSpec((block_rows, _LANES), lambda i: (i, 0))
    out_spec = pl.BlockSpec((1, _SUBLANES, _LANES), lambda i: (i, 0, 0))

    kernel = functools.partial(
        _mse_mask_kernel,
        block_rows=block_rows,
        valid_rows_last=valid_rows_last,
        needs_mask=needs_mask)

    in_bytes = sum(int(a.size) * a.dtype.itemsize for a in (o2, t2, om2, tm2))
    out_bytes = int(nblocks) * _SUBLANES * _LANES * 4

    partials = pl.pallas_call(
        kernel,
        out_shape=jax.ShapeDtypeStruct((nblocks, _SUBLANES, _LANES),
                                       jnp.float32),
        grid_spec=pltpu.PrefetchScalarGridSpec(
            num_scalar_prefetch=0,
            grid=(nblocks,),
            in_specs=[tile_spec, tile_spec, tile_spec, tile_spec],
            out_specs=out_spec,
        ),
        compiler_params=pltpu.CompilerParams(
            dimension_semantics=("parallel",),
            vmem_limit_bytes=32 * 1024 * 1024,
        ),
        cost_estimate=pl.CostEstimate(
            flops=5 * n_elems, transcendentals=0,
            bytes_accessed=in_bytes + out_bytes),
    )(o2, t2, om2, tm2)

    # Tiny wrapper-side reduction of the per-block partials, then the mean.
    return jnp.sum(partials) * jnp.float32(1.0 / n_elems)


def _reference(output, target, output_mask, target_mask):
    o = output * output_mask.astype(output.dtype)
    t = target * target_mask.astype(target.dtype)
    return jnp.mean((o - t) * (o - t))


def _run_case(key, shape):
    k1, k2, k3, k4 = jax.random.split(key, 4)
    output = jax.random.normal(k1, shape, dtype=jnp.float32)
    target = jax.random.normal(k2, shape, dtype=jnp.float32)
    # Masks stream as int8 (the low-bandwidth path); kernel casts in VMEM.
    output_mask = (jax.random.uniform(k3, shape) > 0.5).astype(jnp.int8)
    target_mask = (jax.random.uniform(k4, shape) > 0.5).astype(jnp.int8)

    loss = mse_mask(output, target, output_mask, target_mask)
    loss = jax.block_until_ready(loss)
    ref = _reference(output, target, output_mask, target_mask)
    assert jnp.allclose(loss, ref, rtol=1e-4, atol=1e-6), (shape, loss, ref)


if __name__ == "__main__":
    key = jax.random.PRNGKey(0)
    k_a, k_b = jax.random.split(key, 2)

    # NCHW, same convention as the PyTorch module's typical usage.
    _run_case(k_a, (2, 4, 16, 16))
    # Larger case: multi-block grid + partial last block (overhang mask path).
    _run_case(k_b, (161, 1024))

    print("KERNEL_OK")
</pallas_src>

<mosaic_0001>
module attributes {stable_mosaic.version = 11 : i64} {
  func.func @_mse_mask_kernel(%arg0: i32, %arg1: memref<16x128xf32, #tpu.memory_space<vmem>>, %arg2: memref<16x128xf32, #tpu.memory_space<vmem>>, %arg3: memref<16x128xi8, #tpu.memory_space<vmem>>, %arg4: memref<16x128xi8, #tpu.memory_space<vmem>>, %arg5: memref<1x8x128xf32, #tpu.memory_space<vmem>>) attributes {dimension_semantics = [#tpu.dimension_semantics<parallel>], iteration_bounds = array<i64: 1>, scalar_prefetch = 0 : i64, scratch_operands = 0 : i64, tpu.core_type = #tpu.core_type<tc>, window_params = [{transform_indices = @transform_0, window_bounds = array<i64: 16, 128>}, {transform_indices = @transform_1, window_bounds = array<i64: 16, 128>}, {transform_indices = @transform_2, window_bounds = array<i64: 16, 128>}, {transform_indices = @transform_3, window_bounds = array<i64: 16, 128>}, {transform_indices = @transform_4, window_bounds = array<i64: 1, 8, 128>}]} {
    %c0 = arith.constant 0 : index
    %c0_0 = arith.constant 0 : index
    %0 = vector.load %arg1[%c0, %c0_0] : memref<16x128xf32, #tpu.memory_space<vmem>>, vector<16x128xf32>
    %c0_1 = arith.constant 0 : index
    %c0_2 = arith.constant 0 : index
    %1 = vector.load %arg3[%c0_1, %c0_2] : memref<16x128xi8, #tpu.memory_space<vmem>>, vector<16x128xi8>
    %2 = arith.sitofp %1 : vector<16x128xi8> to vector<16x128xf32>
    %3 = arith.mulf %0, %2 : vector<16x128xf32>
    %c0_3 = arith.constant 0 : index
    %c0_4 = arith.constant 0 : index
    %4 = vector.load %arg2[%c0_3, %c0_4] : memref<16x128xf32, #tpu.memory_space<vmem>>, vector<16x128xf32>
    %c0_5 = arith.constant 0 : index
    %c0_6 = arith.constant 0 : index
    %5 = vector.load %arg4[%c0_5, %c0_6] : memref<16x128xi8, #tpu.memory_space<vmem>>, vector<16x128xi8>
    %6 = arith.sitofp %5 : vector<16x128xi8> to vector<16x128xf32>
    %7 = arith.mulf %4, %6 : vector<16x128xf32>
    %8 = arith.subf %3, %7 : vector<16x128xf32>
    %9 = arith.mulf %8, %8 : vector<16x128xf32>
    %10 = vector.shape_cast %9 : vector<16x128xf32> to vector<2x8x128xf32>
    %cst = arith.constant dense<0.000000e+00> : vector<8x128xf32>
    %11 = vector.multi_reduction <add>, %10, %cst [0] : vector<2x8x128xf32> to vector<8x128xf32>
    %c0_7 = arith.constant 0 : index
    %c0_8 = arith.constant 0 : index
    %c0_9 = arith.constant 0 : index
    %12 = vector.load %arg5[%c0_7, %c0_8, %c0_9] : memref<1x8x128xf32, #tpu.memory_space<vmem>>, vector<1x8x128xf32>
    %13 = vector.shape_cast %12 : vector<1x8x128xf32> to vector<8x128xf32>
    %14 = vector.shape_cast %11 : vector<8x128xf32> to vector<1x8x128xf32>
    tpu.vector_store %arg5[%c0_7, %c0_8, %c0_9], %14 {strides = array<i32>} : memref<1x8x128xf32, #tpu.memory_space<vmem>>, vector<1x8x128xf32>,
    return
  }
  func.func @transform_0(%arg0: i32) -> (i32, i32) {
    %c0_i32 = arith.constant 0 : i32
    %c0_i32_0 = arith.constant 0 : i32
    return %arg0, %c0_i32 : i32, i32
  }
  func.func @transform_1(%arg0: i32) -> (i32, i32) {
    %c0_i32 = arith.constant 0 : i32
    %c0_i32_0 = arith.constant 0 : i32
    return %arg0, %c0_i32 : i32, i32
  }
  func.func @transform_2(%arg0: i32) -> (i32, i32) {
    %c0_i32 = arith.constant 0 : i32
    %c0_i32_0 = arith.constant 0 : i32
    return %arg0, %c0_i32 : i32, i32
  }
  func.func @transform_3(%arg0: i32) -> (i32, i32) {
    %c0_i32 = arith.constant 0 : i32
    %c0_i32_0 = arith.constant 0 : i32
    return %arg0, %c0_i32 : i32, i32
  }
  func.func @transform_4(%arg0: i32) -> (i32, i32, i32) {
    %c0_i32 = arith.constant 0 : i32
    %c0_i32_0 = arith.constant 0 : i32
    %c0_i32_1 = arith.constant 0 : i32
    return %arg0, %c0_i32, %c0_i32_0 : i32, i32, i32
  }
}

</mosaic_0001>

<bundles_post_ra>
// kernel: tpu_custom_call.1
= control target key start
LH: loop header
LB: loop body
LE: loop exit
PB: predicated region body
PF: predicated region fallthrough
CT: control target
= control target key end

     0   :  { %9 = vsyncpa [#allocation3], 0  ;;  %s245_s0 = inlined_call_operand.hbm [shape: f32[16,128], index: 0, kind: input, shape index: {}]   ;;  %s246_s1 = inlined_call_operand.hbm [shape: f32[16,128], index: 1, kind: input, shape index: {}]   ;;  %s247_s2 = inlined_call_operand.vmem [shape: s8[16,128], index: 2, kind: input, shape index: {}]   ;;  %s248_s3 = inlined_call_operand.vmem [shape: s8[16,128], index: 3, kind: input, shape index: {}]   ;;  %s249_s4 = inlined_call_operand.hbm [shape: f32[1,8,128], index: 4, kind: output, shape index: {}]  }
   0x1   :  { %10 = vsyncpa [#allocation6], 0 }
   0x2   :  { %11 = vsyncpa [#allocation4], 0  ;;  %s173_s15 = smov [#allocation2]   ;;  %s101_s19 = scalar_lea.hbm %s245_s0, 256 }
   0x3   :  { %s17_s16 = sshll.u32 %s173_s15, 4  ;;  %p102_p0 = scmp.ne.s32.totalorder %s245_s0, %s101_s19  ;;  %s18_s16 = int_to_ptr.vmem [resolvable:$true] %s17_s16 }
   0x4   :  { %p105_p1 = scmp.lt.u32.totalorder %s101_s19, %s245_s0 }
   0x6   :  { %p107_p2 = pnand %p105_p1, %p102_p0 }
   0x8   :  { %110 = shalt.err (!%p107_p2)
}
   0x9   :  { %s111_s24 = scalar_lea.vmem %s18_s16, 256  ;;  %p116_p4 = scmp.lt.s32.totalorder %s18_s16, %s18_s16 }
   0xa   :  { %p112_p3 = scmp.ne.s32.totalorder %s18_s16, %s111_s24  ;;  %p117_p5 = scmp.lt.s32.totalorder %s111_s24, %s111_s24 }
   0xc   :  { %p118_p6 = por %p117_p5, %p116_p4 }
   0xe   :  { %p119_p7 = pnand %p118_p6, %p112_p3 }
  0x10   :  { %122 = shalt.err (!%p119_p7)
}
  0x11   :  { %s174_s25 = smov 128   ;;  %s175_s26 = smov 8  }
  0x12   :  { %23 = dma.hbm_to_vmem [thread:$0]  %s245_s0, 256, %s18_s16, [#allocation3], %s174_s25, %s174_s25, %s175_s26  }
  0x13   :  { %s176_s29 = smov [#allocation5]   ;;  %s123_s7 = scalar_lea.hbm %s246_s1, 256 }
  0x14   :  { %s29_s30 = sshll.u32 %s176_s29, 4  ;;  %p124_p8 = scmp.ne.s32.totalorder %s246_s1, %s123_s7  ;;  %s30_s30 = int_to_ptr.vmem [resolvable:$true] %s29_s30 }
  0x15   :  { %p127_p9 = scmp.lt.u32.totalorder %s123_s7, %s246_s1 }
  0x17   :  { %p129_p10 = pnand %p127_p9, %p124_p8 }
  0x19   :  { %132 = shalt.err (!%p129_p10)
}
  0x1a   :  { %s133_s12 = scalar_lea.vmem %s30_s30, 256  ;;  %p138_p12 = scmp.lt.s32.totalorder %s30_s30, %s30_s30 }
  0x1b   :  { %p134_p11 = scmp.ne.s32.totalorder %s30_s30, %s133_s12  ;;  %p139_p13 = scmp.lt.s32.totalorder %s133_s12, %s133_s12 }
  0x1d   :  { %p140_p0 = por %p139_p13, %p138_p12 }
  0x1f   :  { %p141_p1 = pnand %p140_p0, %p134_p11 }
  0x21   :  { %144 = shalt.err (!%p141_p1)
}
  0x22   :  { %35 = dma.hbm_to_vmem [thread:$0]  %s246_s1, 256, %s30_s30, [#allocation6], %s174_s25, %s174_s25, %s175_s26  }
  0x23   :  { %167 = dma.done.wait [#allocation3], 256  }
  0x24   :  { %168 = vsyncadd [#allocation3], 4294967040 }
  0x25   :  { %169 = dma.done.wait [#allocation6], 256  }
  0x26   :  { %170 = vsyncadd [#allocation6], 4294967040  ;;  %v89_v0 = vld [vmem:[%s247_s2] sm:$0xf]   ;;  %v47_v5 = vld [vmem:[#allocation2 + $0x8] sm:$0xff]  ;;  %s177_s1 = smov [#allocation7]  }
  0x27   :  { %v90_v1 = vunpack.c.0.s8 %v89_v0  ;;  %v91_v2 = vunpack.c.1.s8 %v89_v0  ;;  %v93_v3 = vld [vmem:[%s248_s3] sm:$0xf]   ;;  %v56_v10 = vld [vmem:[#allocation5] sm:$0xff]  ;;  %v57_v11 = vld [vmem:[#allocation5 + $0x8] sm:$0xff]  ;;  %s78_s2 = sshll.u32 %s177_s1, 4  ;;  %s79_s2 = int_to_ptr.vmem [resolvable:$true] %s78_s2 }
  0x28   :  { %v46_v4 = vld [vmem:[#allocation2] sm:$0xff]  ;;  %v94_v6 = vunpack.c.0.s8 %v93_v3  ;;  %v95_v7 = vunpack.c.1.s8 %v93_v3  ;;  %s145_s3 = scalar_lea.vmem %s79_s2, 128  ;;  %p150_p3 = scmp.lt.s32.totalorder %s79_s2, %s79_s2 }
  0x29   :  { %v52_v8 = vcvt.s32.f32 %v90_v1  ;;  %v53_v9 = vcvt.s32.f32 %v91_v2  ;;  %p146_p2 = scmp.ne.s32.totalorder %s79_s2, %s145_s3  ;;  %p151_p4 = scmp.lt.s32.totalorder %s145_s3, %s145_s3 }
  0x2a   :  { %v62_v12 = vcvt.s32.f32 %v94_v6  ;;  %v63_v13 = vcvt.s32.f32 %v95_v7 }
  0x2b   :  { %v54_v14 = vmul.f32 %v52_v8, %v46_v4  ;;  %v55_v15 = vmul.f32 %v53_v9, %v47_v5  ;;  %p152_p5 = por %p151_p4, %p150_p3 }
  0x2c   :  { %v64_v16 = vmul.f32 %v62_v12, %v56_v10  ;;  %v65_v17 = vmul.f32 %v63_v13, %v57_v11 }
  0x2d   :  { %p153_p6 = pnand %p152_p5, %p146_p2 }
  0x2e   :  { %v66_v18 = vsub.f32 %v54_v14, %v64_v16  ;;  %v67_v19 = vsub.f32 %v55_v15, %v65_v17 }
  0x30   :  { %v68_v20 = vmul.f32 %v66_v18, %v66_v18  ;;  %v69_v21 = vmul.f32 %v67_v19, %v67_v19 }
  0x32   :  { %v70_v22 = vadd.f32 %v69_v21, %v68_v20 }
  0x34   :  { %71 = vst [vmem:[#allocation7] sm:$0xff] %v70_v22 }
  0x35   :  { %156 = shalt.err (!%p153_p6)
}
  0x36   :  { %s157_s20 = scalar_lea.hbm %s249_s4, 128 }
  0x37   :  { %p158_p7 = scmp.ne.s32.totalorder %s249_s4, %s157_s20  ;;  %p161_p8 = scmp.lt.u32.totalorder %s157_s20, %s249_s4 }
  0x39   :  { %p163_p9 = pnand %p161_p8, %p158_p7 }
  0x3b   :  { %166 = shalt.err (!%p163_p9)
}
  0x3c   :  { %81 = dma.vmem_to_hbm [thread:$0]  %s79_s2, 128, %s249_s4, [#allocation4]  }
  0x3d   :  { %171 = dma.done.wait [#allocation4], 128  }
  0x3e   :  { %172 = vsyncadd [#allocation4], 4294967168 }
  0x3f   :  { %85 = vsyncpa [#allocation3], 1 }
  0x40   :  { %86 = vsyncpa [#allocation6], 1 }
  0x41   :  { %87 = vsyncpa [#allocation4], 1 }

</bundles_post_ra>
